<compile_context>
chip_gen: v7x
topology: tpu7x:2x2x1
jax: 0.10.0
libtpu: 0.0.40
codegen_flags: <defaults>
</compile_context>

<pallas_src>
import jax
import jax.numpy as jnp
from jax import lax
from jax.experimental import pallas as pl
from jax.experimental.pallas import tpu as pltpu

NUM_CLASSES = 1
IN_FEATURES = 32 * 8 * 8  # 2048


def fc1_kernel(x_ref, w_ref, b_ref, o_ref):
    """num_classes==1 linear head, lane-dense in and lane-dense out.

    x_ref: (tm, D)     VMEM  activation rows (streamed, lane-dense along D)
    w_ref: (8, D)      VMEM  weight row replicated to 8 sublanes (resident)
    b_ref: (1,)        SMEM  scalar bias
    o_ref: (1, 1, tm)  VMEM  per-row results laid out along lanes
    """
    # Contract the minor (D) dim of both operands: y[r, t] = sum_d w[r,d]*x[t,d].
    # Both operands stay lane-dense and the result already has the batch along
    # lanes, so no (tm, D) temporary and no cross-layout transpose is needed.
    y = lax.dot_general(
        w_ref[...], x_ref[...],
        dimension_numbers=(((1,), (1,)), ((), ())),
        preferred_element_type=jnp.float32,
    )                                                  # (8, tm); rows identical
    o_ref[...] = (y[0:1, :] + b_ref[0]).reshape(o_ref.shape)


def _round_up(x, m):
    return ((x + m - 1) // m) * m


def custom_model_forward(x_nchw, w, b, *, tm_max=1024):
    """x_nchw: (B, 32, 8, 8); w: (num_classes, 2048); b: (num_classes,)."""
    B = x_nchw.shape[0]
    assert B >= 1
    x_flat = x_nchw.reshape(B, -1)                 # matches torch .view(B, -1)
    D = x_flat.shape[1]
    N = w.shape[0]
    assert N == NUM_CLASSES == 1, "kernel is specialised for num_classes == 1"
    assert D % 128 == 0

    # Stream activations at their native width when MXU-friendly (bf16 halves
    # HBM traffic); never add a wrapper-side cast pass for an f32 producer.
    if x_flat.dtype not in (jnp.float32, jnp.bfloat16):
        x_flat = x_flat.astype(jnp.float32)
    in_dtype = x_flat.dtype
    itemsize = jnp.zeros((), in_dtype).dtype.itemsize

    # No full-batch padding (that would rewrite every activation byte in HBM).
    # Only a tiny batch is padded up to one 8-row sublane tile (<64 KiB).
    B_eff = B
    if B < 8:
        x_flat = jnp.pad(x_flat, ((0, 8 - B), (0, 0)))
        B_eff = 8

    # Batch tile: multiple of 8, capped at tm_max; aim for >= 2 grid steps so
    # the "parallel" batch axis shards across v7x's two TensorCores.
    if B_eff <= 2 * tm_max:
        tm = min(tm_max, _round_up(pl.cdiv(B_eff, 2), 8))
    else:
        tm = tm_max
    num_tiles = pl.cdiv(B_eff, tm)

    # Weight row replicated to 8 sublanes (64 KiB, resident); keeps the MXU
    # operand sublane-aligned.  Bias is a single f32 scalar through SMEM.
    w_rows = jnp.broadcast_to(w.reshape(1, D).astype(in_dtype), (8, D))
    b_s = b.reshape(1).astype(jnp.float32)

    out_slab = pl.pallas_call(
        fc1_kernel,
        out_shape=jax.ShapeDtypeStruct((num_tiles, 1, tm), jnp.float32),
        grid=(num_tiles,),
        in_specs=[
            pl.BlockSpec((tm, D), lambda i: (i, 0)),               # streamed activations
            pl.BlockSpec((8, D), lambda i: (0, 0)),                # resident weight rows
            pl.BlockSpec(memory_space=pltpu.MemorySpace.SMEM),     # scalar bias
        ],
        out_specs=pl.BlockSpec((1, 1, tm), lambda i: (i, 0, 0)),   # lane-dense slab
        compiler_params=pltpu.CompilerParams(
            dimension_semantics=("parallel",),     # shards tiles across v7x's 2 TCs
            vmem_limit_bytes=32 << 20,             # tm=1024 double-buffered fits on v5e/v6e/v7x
        ),
        cost_estimate=pl.CostEstimate(
            flops=2 * B_eff * D * N,
            transcendentals=0,
            bytes_accessed=B_eff * D * itemsize + 8 * D * itemsize + 4
                           + num_tiles * tm * 4,
        ),
    )(x_flat, w_rows, b_s)
    # NOTE: pipeline_mode=pl.Buffered(3) on the activation spec is a ~1-3% knob
    # once profiled with VMEM headroom confirmed; left at the default of 2.

    # (num_tiles, 1, tm) -> flat per-row results -> (B, num_classes)
    return out_slab.reshape(num_tiles * tm)[:B].reshape(B, N)


def init_params(key):
    # Mimic nn.Linear default init: U(-1/sqrt(fan_in), 1/sqrt(fan_in))
    kw, kb = jax.random.split(key)
    bound = 1.0 / jnp.sqrt(jnp.float32(IN_FEATURES))
    w = jax.random.uniform(kw, (NUM_CLASSES, IN_FEATURES), jnp.float32, -bound, bound)
    b = jax.random.uniform(kb, (NUM_CLASSES,), jnp.float32, -bound, bound)
    return w, b


if __name__ == "__main__":
    key = jax.random.PRNGKey(0)
    kx, kp = jax.random.split(key)
    # forward's view(B, -1) + Linear(2048, 1) implies the input flattens to 2048:
    x = jax.random.normal(kx, (2, 32, 8, 8), jnp.float32)
    w, b = init_params(kp)

    y = custom_model_forward(x, w, b)
    jax.block_until_ready(y)

    # Cross-check against a high-precision JAX reference (tolerance covers the
    # MXU's f32 multi-pass rounding).
    y_ref = jnp.dot(x.reshape(x.shape[0], -1), w.T,
                    precision=lax.Precision.HIGHEST) + b
    assert y.shape == (2, NUM_CLASSES)
    assert jnp.allclose(y, y_ref, atol=5e-3, rtol=5e-3)
    print("KERNEL_OK")

    # NOTE: conv1/relu/maxpool/conv2 are defined in __init__ but never used in
    # forward(), so they are intentionally not implemented.
</pallas_src>

<mosaic_0001>
module attributes {stable_mosaic.version = 11 : i64} {
  func.func @fc1_kernel(%arg0: i32, %arg1: memref<8x2048xf32, #tpu.memory_space<vmem>>, %arg2: memref<8x2048xf32, #tpu.memory_space<vmem>>, %arg3: memref<1xf32, #tpu.memory_space<smem>>, %arg4: memref<1x1x8xf32, #tpu.memory_space<vmem>>) attributes {dimension_semantics = [#tpu.dimension_semantics<parallel>], iteration_bounds = array<i64: 1>, scalar_prefetch = 0 : i64, scratch_operands = 0 : i64, tpu.core_type = #tpu.core_type<tc>, window_params = [{transform_indices = @transform_0, window_bounds = array<i64: 8, 2048>}, {pipeline_mode = #tpu.pipeline_mode<synchronous>, transform_indices = @transform_1, window_bounds = array<i64: 8, 2048>}, {transform_indices = @transform_2, window_bounds = array<i64: 1>}, {transform_indices = @transform_3, window_bounds = array<i64: 1, 1, 8>}]} {
    %c0 = arith.constant 0 : index
    %c0_0 = arith.constant 0 : index
    %0 = vector.load %arg2[%c0, %c0_0] : memref<8x2048xf32, #tpu.memory_space<vmem>>, vector<8x2048xf32>
    %c0_1 = arith.constant 0 : index
    %c0_2 = arith.constant 0 : index
    %1 = vector.load %arg1[%c0_1, %c0_2] : memref<8x2048xf32, #tpu.memory_space<vmem>>, vector<8x2048xf32>
    %cst = arith.constant dense<0.000000e+00> : vector<8x8xf32>
    %2 = tpu.matmul %0, %1, %cst {dimension_numbers = #tpu.dot_dimension_numbers<[1], [1], [0], [0], [0, 0, 1, 0], [], []>} : vector<8x2048xf32>, vector<8x2048xf32>, vector<8x8xf32> -> vector<8x8xf32>
    %3 = vector.extract_strided_slice %2 {offsets = [0, 0], sizes = [1, 8], strides = [1, 1]} : vector<8x8xf32> to vector<1x8xf32>
    %c0_3 = arith.constant 0 : index
    %4 = memref.load %arg3[%c0_3] : memref<1xf32, #tpu.memory_space<smem>>
    %5 = vector.broadcast %4 : f32 to vector<1x8xf32>
    %6 = arith.addf %3, %5 : vector<1x8xf32>
    %7 = vector.shape_cast %6 : vector<1x8xf32> to vector<1x1x8xf32>
    %c0_4 = arith.constant 0 : index
    %c0_5 = arith.constant 0 : index
    %c0_6 = arith.constant 0 : index
    %8 = vector.load %arg4[%c0_4, %c0_5, %c0_6] : memref<1x1x8xf32, #tpu.memory_space<vmem>>, vector<1x1x8xf32>
    tpu.vector_store %arg4[%c0_4, %c0_5, %c0_6], %7 {strides = array<i32>} : memref<1x1x8xf32, #tpu.memory_space<vmem>>, vector<1x1x8xf32>,
    return
  }
  func.func @transform_0(%arg0: i32) -> (i32, i32) {
    %c0_i32 = arith.constant 0 : i32
    %c0_i32_0 = arith.constant 0 : i32
    return %arg0, %c0_i32 : i32, i32
  }
  func.func @transform_1(%arg0: i32) -> (i32, i32) {
    %c0_i32 = arith.constant 0 : i32
    %c0_i32_0 = arith.constant 0 : i32
    %c0_i32_1 = arith.constant 0 : i32
    return %c0_i32, %c0_i32_0 : i32, i32
  }
  func.func @transform_2(%arg0: i32) -> i32 {
    %c0_i32 = arith.constant 0 : i32
    %c0_i32_0 = arith.constant 0 : i32
    return %c0_i32 : i32
  }
  func.func @transform_3(%arg0: i32) -> (i32, i32, i32) {
    %c0_i32 = arith.constant 0 : i32
    %c0_i32_0 = arith.constant 0 : i32
    %c0_i32_1 = arith.constant 0 : i32
    return %arg0, %c0_i32, %c0_i32_0 : i32, i32, i32
  }
}

</mosaic_0001>

<bundles_post_ra>
// kernel: tpu_custom_call.1
= control target key start
LH: loop header
LB: loop body
LE: loop exit
PB: predicated region body
PF: predicated region fallthrough
CT: control target
= control target key end

     0   :  { %9 = vsyncpa [#allocation4], 0  ;;  %s790_s0 = inlined_call_operand.hbm [shape: f32[8,2048], index: 0, kind: input, shape index: {}]   ;;  %s791_s1 = inlined_call_operand.hbm [shape: f32[8,2048], index: 1, kind: input, shape index: {}]   ;;  %s792_s2 = inlined_call_operand.<no memory space> [shape: f32[1], index: 2, kind: input, shape index: {}]   ;;  %s793_s3 = inlined_call_operand.hbm [shape: f32[1,1,8], index: 3, kind: output, shape index: {}]  }
   0x1   :  { %10 = vsyncpa [#allocation7], 0 }
   0x2   :  { %11 = vsyncpa [#allocation5], 0  ;;  %s728_s12 = smov [#allocation3]   ;;  %s729_s14 = smov [#allocation6]  }
   0x3   :  { %s18_s13 = sshll.u32 %s728_s12, 4  ;;  %s28_s15 = sshll.u32 %s729_s14, 4  ;;  %s19_s13 = int_to_ptr.vmem [resolvable:$true] %s18_s13  ;;  %s29_s15 = int_to_ptr.vmem [resolvable:$true] %s28_s15 }
   0x4   :  { %s656_s18 = scalar_lea.hbm %s790_s0, 2048 }
   0x5   :  { %p657_p0 = scmp.ne.s32.totalorder %s790_s0, %s656_s18  ;;  %p660_p1 = scmp.lt.u32.totalorder %s656_s18, %s790_s0 }
   0x7   :  { %p662_p2 = pnand %p660_p1, %p657_p0 }
   0x9   :  { %665 = shalt.err (!%p662_p2)
}
   0xa   :  { %s666_s23 = scalar_lea.vmem %s19_s13, 2048  ;;  %p671_p4 = scmp.lt.s32.totalorder %s19_s13, %s19_s13 }
   0xb   :  { %p667_p3 = scmp.ne.s32.totalorder %s19_s13, %s666_s23  ;;  %p672_p5 = scmp.lt.s32.totalorder %s666_s23, %s666_s23 }
   0xd   :  { %p673_p6 = por %p672_p5, %p671_p4 }
   0xf   :  { %p674_p7 = pnand %p673_p6, %p667_p3 }
  0x11   :  { %677 = shalt.err (!%p674_p7)
}
  0x12   :  { %21 = dma.hbm_to_vmem [thread:$0]  %s790_s0, 2048, %s19_s13, [#allocation4]  }
  0x13   :  { %s678_s28 = scalar_lea.hbm %s791_s1, 2048 }
  0x14   :  { %p679_p8 = scmp.ne.s32.totalorder %s791_s1, %s678_s28  ;;  %p682_p9 = scmp.lt.u32.totalorder %s678_s28, %s791_s1 }
  0x16   :  { %p684_p10 = pnand %p682_p9, %p679_p8 }
  0x18   :  { %687 = shalt.err (!%p684_p10)
}
  0x19   :  { %s688_s6 = scalar_lea.vmem %s29_s15, 2048  ;;  %p693_p12 = scmp.lt.s32.totalorder %s29_s15, %s29_s15 }
  0x1a   :  { %p689_p11 = scmp.ne.s32.totalorder %s29_s15, %s688_s6  ;;  %p694_p13 = scmp.lt.s32.totalorder %s688_s6, %s688_s6 }
  0x1c   :  { %p695_p0 = por %p694_p13, %p693_p12 }
  0x1e   :  { %p696_p1 = pnand %p695_p0, %p689_p11 }
  0x20   :  { %699 = shalt.err (!%p696_p1)
}
  0x21   :  { %31 = dma.hbm_to_vmem [thread:$0]  %s791_s1, 2048, %s29_s15, [#allocation7]  }
  0x22   :  { %722 = dma.done.wait [#allocation4], 2048  }
  0x23   :  { %723 = vsyncadd [#allocation4], 4294965248 }
  0x24   :  { %724 = dma.done.wait [#allocation7], 2048  }
  0x25   :  { %725 = vsyncadd [#allocation7], 4294965248  ;;  %v57_v0 = vld [vmem:[#allocation3 + $0x8] sm:$0xff]  ;;  %v56_v1 = vld [vmem:[#allocation3] sm:$0xff]  ;;  %v633_v53 = vstv %s792_s2  ;;  %s730_s9 = smov [#allocation8]   ;;  %vm635_vm0 = vcmask 57344  }
  0x26   :  { %v59_v2 = vld [vmem:[#allocation3 + $0x18] sm:$0xff]  ;;  %72 = vmatprep.subr.mxu0 %v57_v0  ;;  %v58_v3 = vld [vmem:[#allocation3 + $0x10] sm:$0xff]  ;;  %v41_v4 = vld [vmem:[#allocation6 + $0x8] sm:$0xff]  ;;  %s643_s10 = sshll.u32 %s730_s9, 4  ;;  %s644_s10 = int_to_ptr.vmem [resolvable:$true] %s643_s10 }
  0x27   :  { %142 = vmatprep.subr.mxu1 %v59_v2  ;;  %v40_v5 = vld [vmem:[#allocation6] sm:$0xff]  ;;  %73 = vmatpush1.xpose.msra.mxu0 %v56_v1  ;;  %v43_v6 = vld [vmem:[#allocation6 + $0x18] sm:$0xff]  ;;  %v61_v7 = vld [vmem:[#allocation3 + $0x28] sm:$0xff]  ;;  %s700_s11 = scalar_lea.vmem %s644_s10, 16  ;;  %s704_s12 = scalar_lea.vmem %s644_s10, 32 }
  0x28   :  { %143 = vmatpush1.xpose.msra.mxu1 %v58_v3  ;;  %v42_v8 = vld [vmem:[#allocation6 + $0x10] sm:$0xff]  ;;  %136 = vmatprep.mubr.f32.mxu0 %v41_v4  ;;  %v60_v9 = vld [vmem:[#allocation3 + $0x20] sm:$0xff]  ;;  %v63_v10 = vld [vmem:[#allocation3 + $0x38] sm:$0xff]  ;;  %p701_p2 = scmp.ne.s32.totalorder %s644_s10, %s700_s11  ;;  %p705_p3 = scmp.lt.s32.totalorder %s644_s10, %s644_s10 }
  0x29   :  { %206 = vmatprep.mubr.f32.mxu1 %v43_v6  ;;  %v45_v11 = vld [vmem:[#allocation6 + $0x28] sm:$0xff]  ;;  %212 = vmatprep.subr.mxu0 %v61_v7  ;;  %v62_v12 = vld [vmem:[#allocation3 + $0x30] sm:$0xff]  ;;  %v47_v14 = vld [vmem:[#allocation6 + $0x38] sm:$0xff]  ;;  %p706_p4 = scmp.lt.s32.totalorder %s704_s12, %s700_s11 }
  0x2a   :  { %282 = vmatprep.subr.mxu1 %v63_v10  ;;  %v65_v13 = vld [vmem:[#allocation3 + $0x48] sm:$0xff]  ;;  %137 = vmatmul.mubr.f32.vlgmr.msra.gmra.mrb[0].mxu0 %v40_v5  ;;  %v44_v15 = vld [vmem:[#allocation6 + $0x20] sm:$0xff]  ;;  %v67_v16 = vld [vmem:[#allocation3 + $0x58] sm:$0xff] }
  0x2b   :  { %207 = vmatmul.mubr.f32.vlgmr.msra.gmra.mrb[0].mxu1 %v42_v8  ;;  %213 = vmatpush1.xpose.msra.mxu0 %v60_v9  ;;  %v64_v17 = vld [vmem:[#allocation3 + $0x40] sm:$0xff]  ;;  %v46_v18 = vld [vmem:[#allocation6 + $0x30] sm:$0xff]  ;;  %v49_v19 = vld [vmem:[#allocation6 + $0x48] sm:$0xff]  ;;  %p707_p5 = por %p706_p4, %p705_p3 }
  0x2c   :  { %276 = vmatprep.mubr.f32.mxu0 %v45_v11  ;;  %283 = vmatpush1.xpose.msra.mxu1 %v62_v12  ;;  %v66_v20 = vld [vmem:[#allocation3 + $0x50] sm:$0xff]  ;;  %v69_v21 = vld [vmem:[#allocation3 + $0x68] sm:$0xff]  ;;  %v51_v22 = vld [vmem:[#allocation6 + $0x58] sm:$0xff] }
  0x2d   :  { %352 = vmatprep.subr.mxu0 %v65_v13  ;;  %346 = vmatprep.mubr.f32.mxu1 %v47_v14  ;;  %v48_v23 = vld [vmem:[#allocation6 + $0x40] sm:$0xff]  ;;  %v71_v24 = vld [vmem:[#allocation3 + $0x78] sm:$0xff]  ;;  %v50_v26 = vld [vmem:[#allocation6 + $0x50] sm:$0xff]  ;;  %p708_p6 = pnand %p707_p5, %p701_p2 }
  0x2e   :  { %422 = vmatprep.subr.mxu1 %v67_v16  ;;  %277 = vmatmul.mubr.f32.vlgmr.msra.gmra.mrb[2].mxu0 %v44_v15  ;;  %v68_v25 = vld [vmem:[#allocation3 + $0x60] sm:$0xff]  ;;  %v53_v27 = vld [vmem:[#allocation6 + $0x68] sm:$0xff]  ;;  %v70_v28 = vld [vmem:[#allocation3 + $0x70] sm:$0xff] }
  0x2f   :  { %353 = vmatpush1.xpose.msra.mxu0 %v64_v17  ;;  %347 = vmatmul.mubr.f32.vlgmr.msra.gmra.mrb[2].mxu1 %v46_v18  ;;  %v55_v29 = vld [vmem:[#allocation6 + $0x78] sm:$0xff]  ;;  %v52_v30 = vld [vmem:[#allocation6 + $0x60] sm:$0xff]  ;;  %v54_v31 = vld [vmem:[#allocation6 + $0x70] sm:$0xff] }
  0x30   :  { %416 = vmatprep.mubr.f32.mxu0 %v49_v19  ;;  %423 = vmatpush1.xpose.msra.mxu1 %v66_v20 }
  0x31   :  { %492 = vmatprep.subr.mxu0 %v69_v21  ;;  %486 = vmatprep.mubr.f32.mxu1 %v51_v22 }
  0x32   :  { %417 = vmatmul.mubr.f32.vlgmr.msra.gmra.mrb[4].mxu0 %v48_v23  ;;  %562 = vmatprep.subr.mxu1 %v71_v24 }
  0x33   :  { %493 = vmatpush1.xpose.msra.mxu0 %v68_v25  ;;  %487 = vmatmul.mubr.f32.vlgmr.msra.gmra.mrb[4].mxu1 %v50_v26 }
  0x34   :  { %556 = vmatprep.mubr.f32.mxu0 %v53_v27  ;;  %563 = vmatpush1.xpose.msra.mxu1 %v70_v28 }
  0x35   :  { %626 = vmatprep.mubr.f32.mxu1 %v55_v29 }
  0x36   :  { %557 = vmatmul.mubr.f32.vlgmr.msra.gmra.mrb[6].mxu0 %v52_v30 }
  0x37   :  { %627 = vmatmul.mubr.f32.vlgmr.msra.gmra.mrb[6].mxu1 %v54_v31 }
  0xfd   :  { %v138_v32 = vpop.f32.mrb[0].mxu0 }
  0xfe   :  { %v208_v33 = vpop.f32.mrb[0].mxu1  ;;  %v140_v34 = vpop.f32.mrb[1].mxu0 }
  0xff   :  { %v209_v35 = vadd.f32 %v208_v33, %v138_v32  ;;  %v210_v36 = vpop.f32.mrb[1].mxu1 }
 0x101   :  { %v278_v37 = vpop.f32.mrb[2].mxu0 }
 0x102   :  { %v279_v38 = vadd.f32 %v278_v37, %v209_v35  ;;  %v280_v39 = vpop.f32.mrb[3].mxu0  ;;  %v348_v40 = vpop.f32.mrb[2].mxu1 }
 0x103   :  { %v350_v41 = vpop.f32.mrb[3].mxu1 }
 0x104   :  { %v349_v42 = vadd.f32 %v348_v40, %v279_v38 }
 0x105   :  { %v418_v43 = vpop.f32.mrb[4].mxu0 }
 0x106   :  { %v419_v44 = vadd.f32 %v418_v43, %v349_v42  ;;  %v420_v45 = vpop.f32.mrb[5].mxu0  ;;  %v488_v46 = vpop.f32.mrb[4].mxu1 }
 0x107   :  { %v490_v47 = vpop.f32.mrb[5].mxu1 }
 0x108   :  { %v489_v48 = vadd.f32 %v488_v46, %v419_v44 }
 0x109   :  { %v558_v49 = vpop.f32.mrb[6].mxu0 }
 0x10a   :  { %v559_v50 = vadd.f32 %v558_v49, %v489_v48  ;;  %v560_v51 = vpop.f32.mrb[7].mxu0  ;;  %v628_v52 = vpop.f32.mrb[6].mxu1 }
 0x10b   :  { %v630_v54 = vpop.f32.mrb[7].mxu1 }
 0x10c   :  { %v629_v55 = vadd.f32 %v628_v52, %v559_v50 }
 0x10e   :  { %v634_v56 = vadd.f32 %v633_v53, %v629_v55 }
 0x110   :  { %636 = vst.msk [vmem:[#allocation8] sm:$0x1] %vm635_vm0, %v634_v56 }
 0x111   :  { %711 = shalt.err (!%p708_p6)
}
 0x112   :  { %s712_s2 = scalar_lea.hbm %s793_s3, 16 }
 0x113   :  { %p713_p7 = scmp.ne.s32.totalorder %s793_s3, %s712_s2  ;;  %p716_p8 = scmp.lt.u32.totalorder %s712_s2, %s793_s3 }
 0x115   :  { %p718_p9 = pnand %p716_p8, %p713_p7 }
 0x117   :  { %721 = shalt.err (!%p718_p9)
}
 0x118   :  { %646 = dma.vmem_to_hbm [thread:$0]  %s644_s10, 16, %s793_s3, [#allocation5]  }
 0x119   :  { %726 = dma.done.wait [#allocation5], 16  }
 0x11a   :  { %727 = vsyncadd [#allocation5], 4294967280 }
 0x11b   :  { %650 = vsyncpa [#allocation4], 1 }
 0x11c   :  { %651 = vsyncpa [#allocation7], 1 }
 0x11d   :  { %652 = vsyncpa [#allocation5], 1 }

</bundles_post_ra>
